<compile_context>
chip_gen: v6e
topology: v6e:2x2x1
jax: 0.10.0
libtpu: 0.0.40
codegen_flags: <defaults>
</compile_context>

<pallas_src>
import functools

import jax
import jax.numpy as jnp
from jax import lax
from jax.experimental import pallas as pl
from jax.experimental.pallas import tpu as pltpu


# ----------------------------------------------------------------------------
# Fused Pallas kernel: two depthwise-separable conv layers per batch element.
# ----------------------------------------------------------------------------
def _make_halo_masks(row, col, H, W):
    """8 edge masks (one per non-center tap), shared by both layers.

    row/col : (1, H*W) int32 pixel coordinates.
    Returns dict {(sy, sx): (1, H*W) bool}.
    """
    masks = {}
    for sy in (-1, 0, 1):
        for sx in (-1, 0, 1):
            if sy == 0 and sx == 0:
                continue
            m = None
            if sy == 1:
                m = row < H - 1
            elif sy == -1:
                m = row >= 1
            if sx == 1:
                c = col < W - 1
                m = c if m is None else jnp.logical_and(m, c)
            elif sx == -1:
                c = col >= 1
                m = c if m is None else jnp.logical_and(m, c)
            masks[(sy, sx)] = m
    return masks


def _dsconv_flat(x, taps, dw_bias, pw_w, pw_bias, masks, W, HW, mxu_dtype):
    """One depthwise-separable conv layer on a flattened (C, H*W) slab.

    x       : (Cin,  H*W) f32 activations (H*W on lanes)
    taps    : (Cin,  9)   f32 depthwise 3x3 taps, BN scale folded in
    dw_bias : (Cin,  1)   f32 folded depthwise-BN bias
    pw_w    : (Cout, Cin) f32 pointwise weight, BN scale folded in
    pw_bias : (Cout, 1)   f32 folded pointwise-BN bias
    masks   : precomputed (1, H*W) edge masks per (sy, sx) tap
    returns : (Cout, H*W) f32
    """
    # Depthwise 3x3: 9 shifted multiply-accumulates.  Shifts are circular lane
    # rotations (XLU slot, free under the VPU-bound loop) + edge masks, which
    # implements SAME zero-padding without materializing a padded tensor.
    acc = x * taps[:, 4:5]                       # center tap (sy=0, sx=0)
    k = 0
    for sy in (-1, 0, 1):
        for sx in (-1, 0, 1):
            if sy == 0 and sx == 0:
                k += 1
                continue
            s = sy * W + sx                      # flat-index shift
            shifted = pltpu.roll(x, shift=(-s) % HW, axis=1)
            shifted = jnp.where(masks[(sy, sx)], shifted, 0.0)
            acc = acc + shifted * taps[:, k:k + 1]
            k += 1

    y = jnp.maximum(acc + dw_bias, 0.0)          # folded BN + ReLU

    # Pointwise 1x1 conv == channel matmul on the MXU; lane-dense (Cout, H*W)
    # result.  bf16 operands with f32 accumulation recommended on v6e/v7x.
    out = jnp.dot(pw_w.astype(mxu_dtype), y.astype(mxu_dtype),
                  preferred_element_type=jnp.float32)
    return jnp.maximum(out + pw_bias, 0.0)       # folded BN + ReLU


def _lsfe_kernel(x_ref, ids_ref, t1_ref, b1_ref, w1_ref, q1_ref,
                 t2_ref, b2_ref, w2_ref, q2_ref, out_ref,
                 *, H, W, mxu_dtype):
    HW = H * W
    ids = ids_ref[...]                           # (2, H*W) int32, loaded once
    row = ids[0:1, :]
    col = ids[1:2, :]

    # Edge masks built once per invocation, reused by both layers / all taps.
    masks = _make_halo_masks(row, col, H, W)

    x = x_ref[0].astype(jnp.float32)             # (Cin, H*W)

    # Layer 1 -> layer 2 fully fused; the intermediate never touches HBM.
    y1 = _dsconv_flat(x, t1_ref[...], b1_ref[...], w1_ref[...], q1_ref[...],
                      masks, W, HW, mxu_dtype)
    y2 = _dsconv_flat(y1, t2_ref[...], b2_ref[...], w2_ref[...], q2_ref[...],
                      masks, W, HW, mxu_dtype)

    out_ref[0] = y2.astype(out_ref.dtype)


# ----------------------------------------------------------------------------
# Wrapper: BN folding + pallas_call
# ----------------------------------------------------------------------------
def _fold_bn(gamma, beta, mean, var, eps=1e-5):
    scale = gamma / jnp.sqrt(var + eps)
    bias = beta - mean * scale
    return scale, bias


def _prep_layer(p):
    """Fold the (inference-mode) BN scales into the conv weights."""
    cin = p["dw_w"].shape[-1]
    cout = p["pw_w"].shape[0]
    taps = (p["dw_w"] * p["dw_scale"][None, None, :]).reshape(9, cin).T  # (cin,9)
    dwb = p["dw_bias"].reshape(cin, 1)
    pww = p["pw_w"] * p["pw_scale"][:, None]                             # (cout,cin)
    pwb = p["pw_bias"].reshape(cout, 1)
    return taps, dwb, pww, pwb


def lsfe_forward(x_nchw, params_l1, params_l2, mxu_dtype=jnp.float32):
    """LSFE forward.  Input/output are NCHW (PyTorch convention)."""
    N, Cin, H, W = x_nchw.shape
    HW = H * W
    Cout = params_l1["pw_w"].shape[0]

    t1, b1, w1, q1 = _prep_layer(params_l1)
    t2, b2, w2, q2 = _prep_layer(params_l2)

    # Pixel coordinates for in-kernel halo masking (SAME zero padding).
    row = jnp.repeat(jnp.arange(H, dtype=jnp.int32), W)
    col = jnp.tile(jnp.arange(W, dtype=jnp.int32), H)
    ids = jnp.stack([row, col], axis=0)          # (2, H*W)

    x_flat = x_nchw.reshape(N, Cin, HW)          # free contiguous merge

    # TODO(synk): for production-sized H*W, tile the spatial axis into row
    # strips (1-row halo) so blocks fit v7x's 64 MiB VMEM and the pipeline has
    # depth; at these test shapes one block per batch element is optimal.
    out_flat = pl.pallas_call(
        functools.partial(_lsfe_kernel, H=H, W=W, mxu_dtype=mxu_dtype),
        out_shape=jax.ShapeDtypeStruct((N, Cout, HW), x_nchw.dtype),
        grid_spec=pltpu.PrefetchScalarGridSpec(
            num_scalar_prefetch=0,
            grid=(N,),
            in_specs=[
                pl.BlockSpec((1, Cin, HW), lambda n: (n, 0, 0)),   # x
                pl.BlockSpec((2, HW), lambda n: (0, 0)),           # ids
                pl.BlockSpec((Cin, 9), lambda n: (0, 0)),          # dw taps L1
                pl.BlockSpec((Cin, 1), lambda n: (0, 0)),          # dw bias L1
                pl.BlockSpec((Cout, Cin), lambda n: (0, 0)),       # pw w    L1
                pl.BlockSpec((Cout, 1), lambda n: (0, 0)),         # pw bias L1
                pl.BlockSpec((Cout, 9), lambda n: (0, 0)),         # dw taps L2
                pl.BlockSpec((Cout, 1), lambda n: (0, 0)),         # dw bias L2
                pl.BlockSpec((Cout, Cout), lambda n: (0, 0)),      # pw w    L2
                pl.BlockSpec((Cout, 1), lambda n: (0, 0)),         # pw bias L2
            ],
            out_specs=pl.BlockSpec((1, Cout, HW), lambda n: (n, 0, 0)),
        ),
        compiler_params=pltpu.CompilerParams(
            dimension_semantics=("parallel",)),   # batch across both TCs (v7x)
    )(x_flat, ids, t1, b1, w1, q1, t2, b2, w2, q2)

    return out_flat.reshape(N, Cout, H, W)       # free contiguous split


# ----------------------------------------------------------------------------
# Parameter construction (deterministic, synthetic) + BN folding
# ----------------------------------------------------------------------------
def make_layer_params(key, cin, cout):
    ks = jax.random.split(key, 10)
    dw_w = 0.1 * jax.random.normal(ks[0], (3, 3, cin), jnp.float32)
    dw_gamma = 1.0 + 0.05 * jax.random.normal(ks[1], (cin,), jnp.float32)
    dw_beta = 0.05 * jax.random.normal(ks[2], (cin,), jnp.float32)
    dw_mean = 0.05 * jax.random.normal(ks[3], (cin,), jnp.float32)
    dw_var = 1.0 + 0.1 * jax.random.uniform(ks[4], (cin,), jnp.float32)

    pw_w = 0.1 * jax.random.normal(ks[5], (cout, cin), jnp.float32)
    pw_gamma = 1.0 + 0.05 * jax.random.normal(ks[6], (cout,), jnp.float32)
    pw_beta = 0.05 * jax.random.normal(ks[7], (cout,), jnp.float32)
    pw_mean = 0.05 * jax.random.normal(ks[8], (cout,), jnp.float32)
    pw_var = 1.0 + 0.1 * jax.random.uniform(ks[9], (cout,), jnp.float32)

    dw_scale, dw_bias = _fold_bn(dw_gamma, dw_beta, dw_mean, dw_var)
    pw_scale, pw_bias = _fold_bn(pw_gamma, pw_beta, pw_mean, pw_var)
    return dict(dw_w=dw_w, dw_scale=dw_scale, dw_bias=dw_bias,
                pw_w=pw_w, pw_scale=pw_scale, pw_bias=pw_bias)


# ----------------------------------------------------------------------------
# Pure-JAX reference (for correctness check) — inference-mode BN, stride 1.
# ----------------------------------------------------------------------------
def ref_dsconv_layer(x_nchw, dw_w, dw_scale, dw_bias, pw_w, pw_scale, pw_bias):
    C = x_nchw.shape[1]
    dk = jnp.transpose(dw_w, (2, 0, 1))[:, None, :, :]        # (C,1,3,3) OIHW
    y = lax.conv_general_dilated(
        x_nchw, dk, window_strides=(1, 1), padding="SAME",
        dimension_numbers=("NCHW", "OIHW", "NCHW"),
        feature_group_count=C, precision=lax.Precision.HIGHEST)
    y = jnp.maximum(y * dw_scale[None, :, None, None]
                    + dw_bias[None, :, None, None], 0.0)
    y = jnp.einsum("nchw,oc->nohw", y, pw_w,
                   precision=lax.Precision.HIGHEST)
    return jnp.maximum(y * pw_scale[None, :, None, None]
                       + pw_bias[None, :, None, None], 0.0)


def ref_lsfe(x_nchw, p1, p2):
    return ref_dsconv_layer(ref_dsconv_layer(x_nchw, **p1), **p2)


# ----------------------------------------------------------------------------
if __name__ == "__main__":
    N, Cin, Cout, H, W = 2, 8, 8, 16, 16

    key = jax.random.PRNGKey(0)
    kx, k1, k2 = jax.random.split(key, 3)
    x = jax.random.normal(kx, (N, Cin, H, W), jnp.float32)    # NCHW input

    params_l1 = make_layer_params(k1, Cin, Cout)
    params_l2 = make_layer_params(k2, Cout, Cout)

    out = jax.block_until_ready(lsfe_forward(x, params_l1, params_l2))
    ref = jax.block_until_ready(ref_lsfe(x, params_l1, params_l2))

    assert out.shape == (N, Cout, H, W)
    assert jnp.max(jnp.abs(out - ref)) < 1e-3, "f32 kernel mismatch vs reference"

    # bf16 MXU operands with f32 accumulation — recommended setting on v6e/v7x.
    out_bf16 = jax.block_until_ready(
        lsfe_forward(x, params_l1, params_l2, mxu_dtype=jnp.bfloat16))
    assert jnp.max(jnp.abs(out_bf16 - ref)) < 2e-2, "bf16 kernel mismatch"

    print("KERNEL_OK")
</pallas_src>

<mosaic_0001>
module attributes {stable_mosaic.version = 11 : i64} {
  func.func @_lsfe_kernel(%arg0: i32, %arg1: memref<1x8x256xf32, #tpu.memory_space<vmem>>, %arg2: memref<2x256xi32, #tpu.memory_space<vmem>>, %arg3: memref<8x9xf32, #tpu.memory_space<vmem>>, %arg4: memref<8x1xf32, #tpu.memory_space<vmem>>, %arg5: memref<8x8xf32, #tpu.memory_space<vmem>>, %arg6: memref<8x1xf32, #tpu.memory_space<vmem>>, %arg7: memref<8x9xf32, #tpu.memory_space<vmem>>, %arg8: memref<8x1xf32, #tpu.memory_space<vmem>>, %arg9: memref<8x8xf32, #tpu.memory_space<vmem>>, %arg10: memref<8x1xf32, #tpu.memory_space<vmem>>, %arg11: memref<1x8x256xf32, #tpu.memory_space<vmem>>) attributes {dimension_semantics = [#tpu.dimension_semantics<parallel>], iteration_bounds = array<i64: 2>, scalar_prefetch = 0 : i64, scratch_operands = 0 : i64, tpu.core_type = #tpu.core_type<tc>, window_params = [{transform_indices = @transform_0, window_bounds = array<i64: 1, 8, 256>}, {pipeline_mode = #tpu.pipeline_mode<synchronous>, transform_indices = @transform_1, window_bounds = array<i64: 2, 256>}, {pipeline_mode = #tpu.pipeline_mode<synchronous>, transform_indices = @transform_2, window_bounds = array<i64: 8, 9>}, {pipeline_mode = #tpu.pipeline_mode<synchronous>, transform_indices = @transform_3, window_bounds = array<i64: 8, 1>}, {pipeline_mode = #tpu.pipeline_mode<synchronous>, transform_indices = @transform_4, window_bounds = array<i64: 8, 8>}, {pipeline_mode = #tpu.pipeline_mode<synchronous>, transform_indices = @transform_5, window_bounds = array<i64: 8, 1>}, {pipeline_mode = #tpu.pipeline_mode<synchronous>, transform_indices = @transform_6, window_bounds = array<i64: 8, 9>}, {pipeline_mode = #tpu.pipeline_mode<synchronous>, transform_indices = @transform_7, window_bounds = array<i64: 8, 1>}, {pipeline_mode = #tpu.pipeline_mode<synchronous>, transform_indices = @transform_8, window_bounds = array<i64: 8, 8>}, {pipeline_mode = #tpu.pipeline_mode<synchronous>, transform_indices = @transform_9, window_bounds = array<i64: 8, 1>}, {transform_indices = @transform_10, window_bounds = array<i64: 1, 8, 256>}]} {
    %c0 = arith.constant 0 : index
    %c0_0 = arith.constant 0 : index
    %0 = vector.load %arg2[%c0, %c0_0] : memref<2x256xi32, #tpu.memory_space<vmem>>, vector<2x256xi32>
    %1 = vector.extract_strided_slice %0 {offsets = [0, 0], sizes = [1, 256], strides = [1, 1]} : vector<2x256xi32> to vector<1x256xi32>
    %2 = vector.extract_strided_slice %0 {offsets = [1, 0], sizes = [1, 256], strides = [1, 1]} : vector<2x256xi32> to vector<1x256xi32>
    %c1_i32 = arith.constant 1 : i32
    %3 = vector.broadcast %c1_i32 : i32 to vector<1x256xi32>
    %4 = arith.cmpi sge, %1, %3 : vector<1x256xi32>
    %c1_i32_1 = arith.constant 1 : i32
    %5 = vector.broadcast %c1_i32_1 : i32 to vector<1x256xi32>
    %6 = arith.cmpi sge, %2, %5 : vector<1x256xi32>
    %7 = arith.andi %4, %6 : vector<1x256xi1>
    %c1_i32_2 = arith.constant 1 : i32
    %8 = vector.broadcast %c1_i32_2 : i32 to vector<1x256xi32>
    %9 = arith.cmpi sge, %1, %8 : vector<1x256xi32>
    %c1_i32_3 = arith.constant 1 : i32
    %10 = vector.broadcast %c1_i32_3 : i32 to vector<1x256xi32>
    %11 = arith.cmpi sge, %1, %10 : vector<1x256xi32>
    %c15_i32 = arith.constant 15 : i32
    %12 = vector.broadcast %c15_i32 : i32 to vector<1x256xi32>
    %13 = arith.cmpi slt, %2, %12 : vector<1x256xi32>
    %14 = arith.andi %11, %13 : vector<1x256xi1>
    %c1_i32_4 = arith.constant 1 : i32
    %15 = vector.broadcast %c1_i32_4 : i32 to vector<1x256xi32>
    %16 = arith.cmpi sge, %2, %15 : vector<1x256xi32>
    %c15_i32_5 = arith.constant 15 : i32
    %17 = vector.broadcast %c15_i32_5 : i32 to vector<1x256xi32>
    %18 = arith.cmpi slt, %2, %17 : vector<1x256xi32>
    %c15_i32_6 = arith.constant 15 : i32
    %19 = vector.broadcast %c15_i32_6 : i32 to vector<1x256xi32>
    %20 = arith.cmpi slt, %1, %19 : vector<1x256xi32>
    %c1_i32_7 = arith.constant 1 : i32
    %21 = vector.broadcast %c1_i32_7 : i32 to vector<1x256xi32>
    %22 = arith.cmpi sge, %2, %21 : vector<1x256xi32>
    %23 = arith.andi %20, %22 : vector<1x256xi1>
    %c15_i32_8 = arith.constant 15 : i32
    %24 = vector.broadcast %c15_i32_8 : i32 to vector<1x256xi32>
    %25 = arith.cmpi slt, %1, %24 : vector<1x256xi32>
    %c15_i32_9 = arith.constant 15 : i32
    %26 = vector.broadcast %c15_i32_9 : i32 to vector<1x256xi32>
    %27 = arith.cmpi slt, %1, %26 : vector<1x256xi32>
    %c15_i32_10 = arith.constant 15 : i32
    %28 = vector.broadcast %c15_i32_10 : i32 to vector<1x256xi32>
    %29 = arith.cmpi slt, %2, %28 : vector<1x256xi32>
    %30 = arith.andi %27, %29 : vector<1x256xi1>
    %c0_11 = arith.constant 0 : index
    %c0_12 = arith.constant 0 : index
    %c0_13 = arith.constant 0 : index
    %31 = vector.load %arg1[%c0_11, %c0_12, %c0_13] : memref<1x8x256xf32, #tpu.memory_space<vmem>>, vector<1x8x256xf32>
    %32 = vector.shape_cast %31 : vector<1x8x256xf32> to vector<8x256xf32>
    %c0_14 = arith.constant 0 : index
    %c0_15 = arith.constant 0 : index
    %33 = vector.load %arg3[%c0_14, %c0_15] : memref<8x9xf32, #tpu.memory_space<vmem>>, vector<8x9xf32>
    %c0_16 = arith.constant 0 : index
    %c0_17 = arith.constant 0 : index
    %34 = vector.load %arg4[%c0_16, %c0_17] : memref<8x1xf32, #tpu.memory_space<vmem>>, vector<8x1xf32>
    %c0_18 = arith.constant 0 : index
    %c0_19 = arith.constant 0 : index
    %35 = vector.load %arg5[%c0_18, %c0_19] : memref<8x8xf32, #tpu.memory_space<vmem>>, vector<8x8xf32>
    %c0_20 = arith.constant 0 : index
    %c0_21 = arith.constant 0 : index
    %36 = vector.load %arg6[%c0_20, %c0_21] : memref<8x1xf32, #tpu.memory_space<vmem>>, vector<8x1xf32>
    %37 = vector.extract_strided_slice %33 {offsets = [0, 4], sizes = [8, 1], strides = [1, 1]} : vector<8x9xf32> to vector<8x1xf32>
    %38 = vector.broadcast %37 : vector<8x1xf32> to vector<8x256xf32>
    %39 = arith.mulf %32, %38 : vector<8x256xf32>
    %c17_i32 = arith.constant 17 : i32
    %40 = tpu.dynamic_rotate %32 by %c17_i32 dim 1 : vector<8x256xf32>, i32 -> vector<8x256xf32>
    %cst = arith.constant 0.000000e+00 : f32
    %41 = vector.shape_cast %7 : vector<1x256xi1> to vector<1x256xi1>
    %42 = vector.broadcast %41 : vector<1x256xi1> to vector<8x256xi1>
    %43 = vector.broadcast %cst : f32 to vector<8x256xf32>
    %44 = arith.select %42, %40, %43 : vector<8x256xi1>, vector<8x256xf32>
    %45 = vector.extract_strided_slice %33 {offsets = [0, 0], sizes = [8, 1], strides = [1, 1]} : vector<8x9xf32> to vector<8x1xf32>
    %46 = vector.broadcast %45 : vector<8x1xf32> to vector<8x256xf32>
    %47 = arith.mulf %44, %46 : vector<8x256xf32>
    %48 = arith.addf %39, %47 : vector<8x256xf32>
    %c16_i32 = arith.constant 16 : i32
    %49 = tpu.dynamic_rotate %32 by %c16_i32 dim 1 : vector<8x256xf32>, i32 -> vector<8x256xf32>
    %cst_22 = arith.constant 0.000000e+00 : f32
    %50 = vector.shape_cast %9 : vector<1x256xi1> to vector<1x256xi1>
    %51 = vector.broadcast %50 : vector<1x256xi1> to vector<8x256xi1>
    %52 = vector.broadcast %cst_22 : f32 to vector<8x256xf32>
    %53 = arith.select %51, %49, %52 : vector<8x256xi1>, vector<8x256xf32>
    %54 = vector.extract_strided_slice %33 {offsets = [0, 1], sizes = [8, 1], strides = [1, 1]} : vector<8x9xf32> to vector<8x1xf32>
    %55 = vector.broadcast %54 : vector<8x1xf32> to vector<8x256xf32>
    %56 = arith.mulf %53, %55 : vector<8x256xf32>
    %57 = arith.addf %48, %56 : vector<8x256xf32>
    %c15_i32_23 = arith.constant 15 : i32
    %58 = tpu.dynamic_rotate %32 by %c15_i32_23 dim 1 : vector<8x256xf32>, i32 -> vector<8x256xf32>
    %cst_24 = arith.constant 0.000000e+00 : f32
    %59 = vector.shape_cast %14 : vector<1x256xi1> to vector<1x256xi1>
    %60 = vector.broadcast %59 : vector<1x256xi1> to vector<8x256xi1>
    %61 = vector.broadcast %cst_24 : f32 to vector<8x256xf32>
    %62 = arith.select %60, %58, %61 : vector<8x256xi1>, vector<8x256xf32>
    %63 = vector.extract_strided_slice %33 {offsets = [0, 2], sizes = [8, 1], strides = [1, 1]} : vector<8x9xf32> to vector<8x1xf32>
    %64 = vector.broadcast %63 : vector<8x1xf32> to vector<8x256xf32>
    %65 = arith.mulf %62, %64 : vector<8x256xf32>
    %66 = arith.addf %57, %65 : vector<8x256xf32>
    %c1_i32_25 = arith.constant 1 : i32
    %67 = tpu.dynamic_rotate %32 by %c1_i32_25 dim 1 : vector<8x256xf32>, i32 -> vector<8x256xf32>
    %cst_26 = arith.constant 0.000000e+00 : f32
    %68 = vector.shape_cast %16 : vector<1x256xi1> to vector<1x256xi1>
    %69 = vector.broadcast %68 : vector<1x256xi1> to vector<8x256xi1>
    %70 = vector.broadcast %cst_26 : f32 to vector<8x256xf32>
    %71 = arith.select %69, %67, %70 : vector<8x256xi1>, vector<8x256xf32>
    %72 = vector.extract_strided_slice %33 {offsets = [0, 3], sizes = [8, 1], strides = [1, 1]} : vector<8x9xf32> to vector<8x1xf32>
    %73 = vector.broadcast %72 : vector<8x1xf32> to vector<8x256xf32>
    %74 = arith.mulf %71, %73 : vector<8x256xf32>
    %75 = arith.addf %66, %74 : vector<8x256xf32>
    %c255_i32 = arith.constant 255 : i32
    %76 = tpu.dynamic_rotate %32 by %c255_i32 dim 1 : vector<8x256xf32>, i32 -> vector<8x256xf32>
    %cst_27 = arith.constant 0.000000e+00 : f32
    %77 = vector.shape_cast %18 : vector<1x256xi1> to vector<1x256xi1>
    %78 = vector.broadcast %77 : vector<1x256xi1> to vector<8x256xi1>
    %79 = vector.broadcast %cst_27 : f32 to vector<8x256xf32>
    %80 = arith.select %78, %76, %79 : vector<8x256xi1>, vector<8x256xf32>
    %81 = vector.extract_strided_slice %33 {offsets = [0, 5], sizes = [8, 1], strides = [1, 1]} : vector<8x9xf32> to vector<8x1xf32>
    %82 = vector.broadcast %81 : vector<8x1xf32> to vector<8x256xf32>
    %83 = arith.mulf %80, %82 : vector<8x256xf32>
    %84 = arith.addf %75, %83 : vector<8x256xf32>
    %c241_i32 = arith.constant 241 : i32
    %85 = tpu.dynamic_rotate %32 by %c241_i32 dim 1 : vector<8x256xf32>, i32 -> vector<8x256xf32>
    %cst_28 = arith.constant 0.000000e+00 : f32
    %86 = vector.shape_cast %23 : vector<1x256xi1> to vector<1x256xi1>
    %87 = vector.broadcast %86 : vector<1x256xi1> to vector<8x256xi1>
    %88 = vector.broadcast %cst_28 : f32 to vector<8x256xf32>
    %89 = arith.select %87, %85, %88 : vector<8x256xi1>, vector<8x256xf32>
    %90 = vector.extract_strided_slice %33 {offsets = [0, 6], sizes = [8, 1], strides = [1, 1]} : vector<8x9xf32> to vector<8x1xf32>
    %91 = vector.broadcast %90 : vector<8x1xf32> to vector<8x256xf32>
    %92 = arith.mulf %89, %91 : vector<8x256xf32>
    %93 = arith.addf %84, %92 : vector<8x256xf32>
    %c240_i32 = arith.constant 240 : i32
    %94 = tpu.dynamic_rotate %32 by %c240_i32 dim 1 : vector<8x256xf32>, i32 -> vector<8x256xf32>
    %cst_29 = arith.constant 0.000000e+00 : f32
    %95 = vector.shape_cast %25 : vector<1x256xi1> to vector<1x256xi1>
    %96 = vector.broadcast %95 : vector<1x256xi1> to vector<8x256xi1>
    %97 = vector.broadcast %cst_29 : f32 to vector<8x256xf32>
    %98 = arith.select %96, %94, %97 : vector<8x256xi1>, vector<8x256xf32>
    %99 = vector.extract_strided_slice %33 {offsets = [0, 7], sizes = [8, 1], strides = [1, 1]} : vector<8x9xf32> to vector<8x1xf32>
    %100 = vector.broadcast %99 : vector<8x1xf32> to vector<8x256xf32>
    %101 = arith.mulf %98, %100 : vector<8x256xf32>
    %102 = arith.addf %93, %101 : vector<8x256xf32>
    %c239_i32 = arith.constant 239 : i32
    %103 = tpu.dynamic_rotate %32 by %c239_i32 dim 1 : vector<8x256xf32>, i32 -> vector<8x256xf32>
    %cst_30 = arith.constant 0.000000e+00 : f32
    %104 = vector.shape_cast %30 : vector<1x256xi1> to vector<1x256xi1>
    %105 = vector.broadcast %104 : vector<1x256xi1> to vector<8x256xi1>
    %106 = vector.broadcast %cst_30 : f32 to vector<8x256xf32>
    %107 = arith.select %105, %103, %106 : vector<8x256xi1>, vector<8x256xf32>
    %108 = vector.extract_strided_slice %33 {offsets = [0, 8], sizes = [8, 1], strides = [1, 1]} : vector<8x9xf32> to vector<8x1xf32>
    %109 = vector.broadcast %108 : vector<8x1xf32> to vector<8x256xf32>
    %110 = arith.mulf %107, %109 : vector<8x256xf32>
    %111 = arith.addf %102, %110 : vector<8x256xf32>
    %112 = vector.broadcast %34 : vector<8x1xf32> to vector<8x256xf32>
    %113 = arith.addf %111, %112 : vector<8x256xf32>
    %cst_31 = arith.constant 0.000000e+00 : f32
    %114 = vector.broadcast %cst_31 : f32 to vector<8x256xf32>
    %115 = arith.maximumf %113, %114 : vector<8x256xf32>
    %cst_32 = arith.constant dense<0.000000e+00> : vector<8x256xf32>
    %116 = tpu.matmul %35, %115, %cst_32 {dimension_numbers = #tpu.dot_dimension_numbers<[1], [0], [0], [1], [0, 0, 1, 1], [], []>} : vector<8x8xf32>, vector<8x256xf32>, vector<8x256xf32> -> vector<8x256xf32>
    %117 = vector.broadcast %36 : vector<8x1xf32> to vector<8x256xf32>
    %118 = arith.addf %116, %117 : vector<8x256xf32>
    %cst_33 = arith.constant 0.000000e+00 : f32
    %119 = vector.broadcast %cst_33 : f32 to vector<8x256xf32>
    %120 = arith.maximumf %118, %119 : vector<8x256xf32>
    %c0_34 = arith.constant 0 : index
    %c0_35 = arith.constant 0 : index
    %121 = vector.load %arg7[%c0_34, %c0_35] : memref<8x9xf32, #tpu.memory_space<vmem>>, vector<8x9xf32>
    %c0_36 = arith.constant 0 : index
    %c0_37 = arith.constant 0 : index
    %122 = vector.load %arg8[%c0_36, %c0_37] : memref<8x1xf32, #tpu.memory_space<vmem>>, vector<8x1xf32>
    %c0_38 = arith.constant 0 : index
    %c0_39 = arith.constant 0 : index
    %123 = vector.load %arg9[%c0_38, %c0_39] : memref<8x8xf32, #tpu.memory_space<vmem>>, vector<8x8xf32>
    %c0_40 = arith.constant 0 : index
    %c0_41 = arith.constant 0 : index
    %124 = vector.load %arg10[%c0_40, %c0_41] : memref<8x1xf32, #tpu.memory_space<vmem>>, vector<8x1xf32>
    %125 = vector.extract_strided_slice %121 {offsets = [0, 4], sizes = [8, 1], strides = [1, 1]} : vector<8x9xf32> to vector<8x1xf32>
    %126 = vector.broadcast %125 : vector<8x1xf32> to vector<8x256xf32>
    %127 = arith.mulf %120, %126 : vector<8x256xf32>
    %c17_i32_42 = arith.constant 17 : i32
    %128 = tpu.dynamic_rotate %120 by %c17_i32_42 dim 1 : vector<8x256xf32>, i32 -> vector<8x256xf32>
    %cst_43 = arith.constant 0.000000e+00 : f32
    %129 = vector.shape_cast %7 : vector<1x256xi1> to vector<1x256xi1>
    %130 = vector.broadcast %129 : vector<1x256xi1> to vector<8x256xi1>
    %131 = vector.broadcast %cst_43 : f32 to vector<8x256xf32>
    %132 = arith.select %130, %128, %131 : vector<8x256xi1>, vector<8x256xf32>
    %133 = vector.extract_strided_slice %121 {offsets = [0, 0], sizes = [8, 1], strides = [1, 1]} : vector<8x9xf32> to vector<8x1xf32>
    %134 = vector.broadcast %133 : vector<8x1xf32> to vector<8x256xf32>
    %135 = arith.mulf %132, %134 : vector<8x256xf32>
    %136 = arith.addf %127, %135 : vector<8x256xf32>
    %c16_i32_44 = arith.constant 16 : i32
    %137 = tpu.dynamic_rotate %120 by %c16_i32_44 dim 1 : vector<8x256xf32>, i32 -> vector<8x256xf32>
    %cst_45 = arith.constant 0.000000e+00 : f32
    %138 = vector.shape_cast %9 : vector<1x256xi1> to vector<1x256xi1>
    %139 = vector.broadcast %138 : vector<1x256xi1> to vector<8x256xi1>
    %140 = vector.broadcast %cst_45 : f32 to vector<8x256xf32>
    %141 = arith.select %139, %137, %140 : vector<8x256xi1>, vector<8x256xf32>
    %142 = vector.extract_strided_slice %121 {offsets = [0, 1], sizes = [8, 1], strides = [1, 1]} : vector<8x9xf32> to vector<8x1xf32>
    %143 = vector.broadcast %142 : vector<8x1xf32> to vector<8x256xf32>
    %144 = arith.mulf %141, %143 : vector<8x256xf32>
    %145 = arith.addf %136, %144 : vector<8x256xf32>
    %c15_i32_46 = arith.constant 15 : i32
    %146 = tpu.dynamic_rotate %120 by %c15_i32_46 dim 1 : vector<8x256xf32>, i32 -> vector<8x256xf32>
    %cst_47 = arith.constant 0.000000e+00 : f32
    %147 = vector.shape_cast %14 : vector<1x256xi1> to vector<1x256xi1>
    %148 = vector.broadcast %147 : vector<1x256xi1> to vector<8x256xi1>
    %149 = vector.broadcast %cst_47 : f32 to vector<8x256xf32>
    %150 = arith.select %148, %146, %149 : vector<8x256xi1>, vector<8x256xf32>
    %151 = vector.extract_strided_slice %121 {offsets = [0, 2], sizes = [8, 1], strides = [1, 1]} : vector<8x9xf32> to vector<8x1xf32>
    %152 = vector.broadcast %151 : vector<8x1xf32> to vector<8x256xf32>
    %153 = arith.mulf %150, %152 : vector<8x256xf32>
    %154 = arith.addf %145, %153 : vector<8x256xf32>
    %c1_i32_48 = arith.constant 1 : i32
    %155 = tpu.dynamic_rotate %120 by %c1_i32_48 dim 1 : vector<8x256xf32>, i32 -> vector<8x256xf32>
    %cst_49 = arith.constant 0.000000e+00 : f32
    %156 = vector.shape_cast %16 : vector<1x256xi1> to vector<1x256xi1>
    %157 = vector.broadcast %156 : vector<1x256xi1> to vector<8x256xi1>
    %158 = vector.broadcast %cst_49 : f32 to vector<8x256xf32>
    %159 = arith.select %157, %155, %158 : vector<8x256xi1>, vector<8x256xf32>
    %160 = vector.extract_strided_slice %121 {offsets = [0, 3], sizes = [8, 1], strides = [1, 1]} : vector<8x9xf32> to vector<8x1xf32>
    %161 = vector.broadcast %160 : vector<8x1xf32> to vector<8x256xf32>
    %162 = arith.mulf %159, %161 : vector<8x256xf32>
    %163 = arith.addf %154, %162 : vector<8x256xf32>
    %c255_i32_50 = arith.constant 255 : i32
    %164 = tpu.dynamic_rotate %120 by %c255_i32_50 dim 1 : vector<8x256xf32>, i32 -> vector<8x256xf32>
    %cst_51 = arith.constant 0.000000e+00 : f32
    %165 = vector.shape_cast %18 : vector<1x256xi1> to vector<1x256xi1>
    %166 = vector.broadcast %165 : vector<1x256xi1> to vector<8x256xi1>
    %167 = vector.broadcast %cst_51 : f32 to vector<8x256xf32>
    %168 = arith.select %166, %164, %167 : vector<8x256xi1>, vector<8x256xf32>
    %169 = vector.extract_strided_slice %121 {offsets = [0, 5], sizes = [8, 1], strides = [1, 1]} : vector<8x9xf32> to vector<8x1xf32>
    %170 = vector.broadcast %169 : vector<8x1xf32> to vector<8x256xf32>
    %171 = arith.mulf %168, %170 : vector<8x256xf32>
    %172 = arith.addf %163, %171 : vector<8x256xf32>
    %c241_i32_52 = arith.constant 241 : i32
    %173 = tpu.dynamic_rotate %120 by %c241_i32_52 dim 1 : vector<8x256xf32>, i32 -> vector<8x256xf32>
    %cst_53 = arith.constant 0.000000e+00 : f32
    %174 = vector.shape_cast %23 : vector<1x256xi1> to vector<1x256xi1>
    %175 = vector.broadcast %174 : vector<1x256xi1> to vector<8x256xi1>
    %176 = vector.broadcast %cst_53 : f32 to vector<8x256xf32>
    %177 = arith.select %175, %173, %176 : vector<8x256xi1>, vector<8x256xf32>
    %178 = vector.extract_strided_slice %121 {offsets = [0, 6], sizes = [8, 1], strides = [1, 1]} : vector<8x9xf32> to vector<8x1xf32>
    %179 = vector.broadcast %178 : vector<8x1xf32> to vector<8x256xf32>
    %180 = arith.mulf %177, %179 : vector<8x256xf32>
    %181 = arith.addf %172, %180 : vector<8x256xf32>
    %c240_i32_54 = arith.constant 240 : i32
    %182 = tpu.dynamic_rotate %120 by %c240_i32_54 dim 1 : vector<8x256xf32>, i32 -> vector<8x256xf32>
    %cst_55 = arith.constant 0.000000e+00 : f32
    %183 = vector.shape_cast %25 : vector<1x256xi1> to vector<1x256xi1>
    %184 = vector.broadcast %183 : vector<1x256xi1> to vector<8x256xi1>
    %185 = vector.broadcast %cst_55 : f32 to vector<8x256xf32>
    %186 = arith.select %184, %182, %185 : vector<8x256xi1>, vector<8x256xf32>
    %187 = vector.extract_strided_slice %121 {offsets = [0, 7], sizes = [8, 1], strides = [1, 1]} : vector<8x9xf32> to vector<8x1xf32>
    %188 = vector.broadcast %187 : vector<8x1xf32> to vector<8x256xf32>
    %189 = arith.mulf %186, %188 : vector<8x256xf32>
    %190 = arith.addf %181, %189 : vector<8x256xf32>
    %c239_i32_56 = arith.constant 239 : i32
    %191 = tpu.dynamic_rotate %120 by %c239_i32_56 dim 1 : vector<8x256xf32>, i32 -> vector<8x256xf32>
    %cst_57 = arith.constant 0.000000e+00 : f32
    %192 = vector.shape_cast %30 : vector<1x256xi1> to vector<1x256xi1>
    %193 = vector.broadcast %192 : vector<1x256xi1> to vector<8x256xi1>
    %194 = vector.broadcast %cst_57 : f32 to vector<8x256xf32>
    %195 = arith.select %193, %191, %194 : vector<8x256xi1>, vector<8x256xf32>
    %196 = vector.extract_strided_slice %121 {offsets = [0, 8], sizes = [8, 1], strides = [1, 1]} : vector<8x9xf32> to vector<8x1xf32>
    %197 = vector.broadcast %196 : vector<8x1xf32> to vector<8x256xf32>
    %198 = arith.mulf %195, %197 : vector<8x256xf32>
    %199 = arith.addf %190, %198 : vector<8x256xf32>
    %200 = vector.broadcast %122 : vector<8x1xf32> to vector<8x256xf32>
    %201 = arith.addf %199, %200 : vector<8x256xf32>
    %cst_58 = arith.constant 0.000000e+00 : f32
    %202 = vector.broadcast %cst_58 : f32 to vector<8x256xf32>
    %203 = arith.maximumf %201, %202 : vector<8x256xf32>
    %cst_59 = arith.constant dense<0.000000e+00> : vector<8x256xf32>
    %204 = tpu.matmul %123, %203, %cst_59 {dimension_numbers = #tpu.dot_dimension_numbers<[1], [0], [0], [1], [0, 0, 1, 1], [], []>} : vector<8x8xf32>, vector<8x256xf32>, vector<8x256xf32> -> vector<8x256xf32>
    %205 = vector.broadcast %124 : vector<8x1xf32> to vector<8x256xf32>
    %206 = arith.addf %204, %205 : vector<8x256xf32>
    %cst_60 = arith.constant 0.000000e+00 : f32
    %207 = vector.broadcast %cst_60 : f32 to vector<8x256xf32>
    %208 = arith.maximumf %206, %207 : vector<8x256xf32>
    %c0_61 = arith.constant 0 : index
    %c0_62 = arith.constant 0 : index
    %c0_63 = arith.constant 0 : index
    %209 = vector.load %arg11[%c0_61, %c0_62, %c0_63] : memref<1x8x256xf32, #tpu.memory_space<vmem>>, vector<1x8x256xf32>
    %210 = vector.shape_cast %209 : vector<1x8x256xf32> to vector<8x256xf32>
    %211 = vector.shape_cast %208 : vector<8x256xf32> to vector<1x8x256xf32>
    tpu.vector_store %arg11[%c0_61, %c0_62, %c0_63], %211 {strides = array<i32>} : memref<1x8x256xf32, #tpu.memory_space<vmem>>, vector<1x8x256xf32>,
    return
  }
  func.func @transform_0(%arg0: i32) -> (i32, i32, i32) {
    %c0_i32 = arith.constant 0 : i32
    %c0_i32_0 = arith.constant 0 : i32
    %c0_i32_1 = arith.constant 0 : i32
    return %arg0, %c0_i32, %c0_i32_0 : i32, i32, i32
  }
  func.func @transform_1(%arg0: i32) -> (i32, i32) {
    %c0_i32 = arith.constant 0 : i32
    %c0_i32_0 = arith.constant 0 : i32
    %c0_i32_1 = arith.constant 0 : i32
    return %c0_i32, %c0_i32_0 : i32, i32
  }
  func.func @transform_2(%arg0: i32) -> (i32, i32) {
    %c0_i32 = arith.constant 0 : i32
    %c0_i32_0 = arith.constant 0 : i32
    %c0_i32_1 = arith.constant 0 : i32
    return %c0_i32, %c0_i32_0 : i32, i32
  }
  func.func @transform_3(%arg0: i32) -> (i32, i32) {
    %c0_i32 = arith.constant 0 : i32
    %c0_i32_0 = arith.constant 0 : i32
    %c0_i32_1 = arith.constant 0 : i32
    return %c0_i32, %c0_i32_0 : i32, i32
  }
  func.func @transform_4(%arg0: i32) -> (i32, i32) {
    %c0_i32 = arith.constant 0 : i32
    %c0_i32_0 = arith.constant 0 : i32
    %c0_i32_1 = arith.constant 0 : i32
    return %c0_i32, %c0_i32_0 : i32, i32
  }
  func.func @transform_5(%arg0: i32) -> (i32, i32) {
    %c0_i32 = arith.constant 0 : i32
    %c0_i32_0 = arith.constant 0 : i32
    %c0_i32_1 = arith.constant 0 : i32
    return %c0_i32, %c0_i32_0 : i32, i32
  }
  func.func @transform_6(%arg0: i32) -> (i32, i32) {
    %c0_i32 = arith.constant 0 : i32
    %c0_i32_0 = arith.constant 0 : i32
    %c0_i32_1 = arith.constant 0 : i32
    return %c0_i32, %c0_i32_0 : i32, i32
  }
  func.func @transform_7(%arg0: i32) -> (i32, i32) {
    %c0_i32 = arith.constant 0 : i32
    %c0_i32_0 = arith.constant 0 : i32
    %c0_i32_1 = arith.constant 0 : i32
    return %c0_i32, %c0_i32_0 : i32, i32
  }
  func.func @transform_8(%arg0: i32) -> (i32, i32) {
    %c0_i32 = arith.constant 0 : i32
    %c0_i32_0 = arith.constant 0 : i32
    %c0_i32_1 = arith.constant 0 : i32
    return %c0_i32, %c0_i32_0 : i32, i32
  }
  func.func @transform_9(%arg0: i32) -> (i32, i32) {
    %c0_i32 = arith.constant 0 : i32
    %c0_i32_0 = arith.constant 0 : i32
    %c0_i32_1 = arith.constant 0 : i32
    return %c0_i32, %c0_i32_0 : i32, i32
  }
  func.func @transform_10(%arg0: i32) -> (i32, i32, i32) {
    %c0_i32 = arith.constant 0 : i32
    %c0_i32_0 = arith.constant 0 : i32
    %c0_i32_1 = arith.constant 0 : i32
    return %arg0, %c0_i32, %c0_i32_0 : i32, i32, i32
  }
}

</mosaic_0001>

<bundles_post_ra>
// kernel: tpu_custom_call.1
= control target key start
LH: loop header
LB: loop body
LE: loop exit
PB: predicated region body
PF: predicated region fallthrough
CT: control target
= control target key end

     0   :  { %s2045_s0 = inlined_call_operand.vmem [shape: f32[2,8,256], index: 0, kind: input, shape index: {}]   ;;  %s2046_s1 = inlined_call_operand.hbm [shape: s32[2,256], index: 1, kind: input, shape index: {}]   ;;  %s2047_s2 = inlined_call_operand.hbm [shape: f32[8,9], index: 2, kind: input, shape index: {}]   ;;  %s2048_s3 = inlined_call_operand.vmem [shape: f32[8,1], index: 3, kind: input, shape index: {}]   ;;  %s2049_s4 = inlined_call_operand.vmem [shape: f32[8,8], index: 4, kind: input, shape index: {}]   ;;  %s2050_s5 = inlined_call_operand.vmem [shape: f32[8,1], index: 5, kind: input, shape index: {}]   ;;  %s2051_s6 = inlined_call_operand.hbm [shape: f32[8,9], index: 6, kind: input, shape index: {}]   ;;  %s2052_s7 = inlined_call_operand.vmem [shape: f32[8,1], index: 7, kind: input, shape index: {}]   ;;  %s2053_s8 = inlined_call_operand.vmem [shape: f32[8,8], index: 8, kind: input, shape index: {}]   ;;  %s2054_s9 = inlined_call_operand.vmem [shape: f32[8,1], index: 9, kind: input, shape index: {}]   ;;  %s2055_s10 = inlined_call_operand.hbm [shape: f32[2,8,256], index: 10, kind: output, shape index: {}]  }
   0x1   :  { %2072 = sst [smem:[#allocation12_spill]] %s2045_s0 }
   0x2   :  { %15 = vsyncpa [#allocation3], 0 }
   0x3   :  { %16 = vsyncpa [#allocation6], 0 }
   0x4   :  { %17 = vsyncpa [#allocation4], 0 }
   0x5   :  { %19 = vsyncpa [#allocation4 + $0x1], 0  ;;  %s1495_s13 = smov 0   ;;  %s1497_s14 = smov 0  }
   0x6   :  { %s1499_s15 = smov 0   ;;  %s1501_s16 = smov 0  }
   0x7 LB: > { %s1516_s17 = sadd.s32 4294967295, %s1416_s16   ;;  %s1137_s18 = sadd.s32 4294967294, %s1416_s16   ;;  %s1416_s16 = sphi %s1501_s16, %s2113_s16   ;;  %s1412_s15 = sphi %s1499_s15, %s2112_s15   ;;  %s1408_s14 = sphi %s1497_s14, %s2111_s14   ;;  %s1404_s13 = sphi %s1495_s13, %s2110_s13  }
   0x8   : > { %s1520_s19 = sadd.s32 1, %s1416_s16   ;;  %s247_s20 = sadd.s32 1, %s1412_s15 }
   0x9   : > { %s244_s21 = ssub.s32 %s1416_s16, %s1520_s19  ;;  %p257_p0 = scmp.ne.s32.totalorder %s1412_s15, %s1408_s14 }
   0xa   : > { %p245_p1 = scmp.eq.s32.totalorder %s244_s21, 0  ;;  %p258_p2 = scmp.eq.s32.totalorder %s1516_s17, 1 }
   0xb   : > { %p263_p3 = scmp.ne.s32.totalorder %s1408_s14, %s1404_s13  ;;  %p264_p4 = scmp.eq.s32.totalorder %s1137_s18, 1 }
   0xc   : > { %s1531_s22 = scalar_select %p245_p1, %s1412_s15, %s247_s20  }
   0xd   : > { %p1533_p5 = por %p258_p2, %p257_p0  ;;  %p1537_p6 = por %p264_p4, %p263_p3 }
   0xe   : > { %p1138_p7 = scmp.ge.s32.totalorder %s1416_s16, 1  ;;  %p271_p8 = scmp.lt.s32.totalorder %s1416_s16, 3 }
   0xf   : > { %s2073_s23 = scalar_select %p1533_p5, 1, 0 }
  0x10   : > { %s2074_s24 = scalar_select %p1537_p6, 1, 0 }
  0x11   : > { %p2056_p9 = scmp.eq.s32.totalorder %s1516_s17, 0  ;;  %p1544_p10 = pnand %p1138_p7, %p271_p8 }
  0x12   : > { %s1418_s26 = smov [#allocation5]   ;;  %s1419_s28 = smov [#allocation2]  }
  0x13   : > { %s2075_s25 = scalar_select %p1544_p10, 1, 0 }
  0x14   : > { %s295_s27 = sshll.u32 %s1418_s26, 4  ;;  %p1175_p11 = pneg %p1544_p10  ;;  %s296_s27 = int_to_ptr.vmem [resolvable:$true] %s295_s27 }
  0x15   : > { %s284_s29 = sshll.u32 %s1419_s28, 4  ;;  %s1420_s11 = smov [#allocation7]   ;;  %s285_s29 = int_to_ptr.vmem [resolvable:$true] %s284_s29 }
  0x16   : > { %p1552_p12 = pnand %p2056_p9, %p1175_p11  ;;  %s315_s12 = sshll.u32 %s1420_s11, 4  ;;  %s1556_s12 = int_to_ptr.vmem [resolvable:$true] %s315_s12 }
  0x17   : > { %s1281_s18 = scalar_lea.vmem %s296_s27, 128  ;;  %p1289_p3 = scmp.lt.s32.totalorder %s296_s27, %s296_s27 }
  0x18   : > { %p1272_p13 = pneg %p1552_p12  ;;  %p1282_p0 = scmp.ne.s32.totalorder %s296_s27, %s1281_s18 }
  0x19   : > { %p1290_p4 = scmp.lt.s32.totalorder %s1281_s18, %s1281_s18 }
  0x1a   : > { %p1284_p1 = pnand %p1282_p0, %p1272_p13 }
  0x1b   : > { %p1291_p7 = por %p1290_p4, %p1289_p3 }
  0x1c   : > { %p1285_p2 = pneg %p1284_p1 }
  0x1e   : > { %p1292_p8 = pnand %p1291_p7, %p1285_p2 }
  0x20   : > { %1295 = shalt.err (!%p1292_p8)
}
  0x21   : > { %1181 = dma.hbm_to_vmem [thread:$0]  (!%p1552_p12), %s2047_s2, 128, %s296_s27, [#allocation6]  }
  0x22   : > { %s1307_s26 = scalar_lea.vmem %s285_s29, 64  ;;  %p1315_p0 = scmp.lt.s32.totalorder %s285_s29, %s285_s29 }
  0x23   : > { %p1308_p11 = scmp.ne.s32.totalorder %s285_s29, %s1307_s26  ;;  %p1316_p1 = scmp.lt.s32.totalorder %s1307_s26, %s1307_s26 }
  0x25   : > { %p1310_p9 = pnand %p1308_p11, %p1272_p13  ;;  %p1317_p5 = por %p1316_p1, %p1315_p0 }
  0x27   : > { %p1311_p6 = pneg %p1310_p9 }
  0x29   : > { %p1318_p10 = pnand %p1317_p5, %p1311_p6 }
  0x2b   : > { %1321 = shalt.err (!%p1318_p10)
}
  0x2c   : > { %1178 = dma.hbm_to_vmem [thread:$0]  (!%p1552_p12), %s2046_s1, 64, %s285_s29, [#allocation3]  }
  0x2d   : > { %s1333_s27 = scalar_lea.vmem %s1556_s12, 128  ;;  %p1341_p4 = scmp.lt.s32.totalorder %s1556_s12, %s1556_s12 }
  0x2e   : > { %p1334_p2 = scmp.ne.s32.totalorder %s1556_s12, %s1333_s27  ;;  %p1342_p5 = scmp.lt.s32.totalorder %s1333_s27, %s1333_s27 }
  0x30   : > { %p1336_p9 = pnand %p1334_p2, %p1272_p13  ;;  %p1343_p6 = por %p1342_p5, %p1341_p4 }
  0x32   : > { %p1337_p3 = pneg %p1336_p9 }
  0x34   : > { %p1344_p10 = pnand %p1343_p6, %p1337_p3 }
  0x36   : > { %1347 = shalt.err (!%p1344_p10)
}
  0x37   : > { %1184 = dma.hbm_to_vmem [thread:$0]  (!%p1552_p12), %s2051_s6, 128, %s1556_s12, [#allocation6]  }
  0x38   : > { %p2077_p7 = scmp.ne.s32.totalorder %s2075_s25, 0 }
  0x39   : > { %p2078_p8 = scmp.eq.s32.totalorder (!%p2077_p7), %s1516_s17, 0 }
  0x3a   : > { %345 = sbr.rel (%p2077_p7) target bundleno = 853 (0x355), region = 60 }
  0x3f   : > { %1391 = dma.done.wait (%p2078_p8), [#allocation3], 64   ;;  %p2079_p13 = pmov %p2078_p8 }
  0x40   : > { %p2080_p11 = pmov %p2078_p8 }
  0x41   : > { %1393 = vsyncadd (%p2079_p13), [#allocation3], 4294967232 }
  0x42   : > { %1395 = dma.done.wait (%p2080_p11), [#allocation6], 256   ;;  %p2081_p0 = pmov %p2078_p8 }
  0x43   : > { %p391_p1 = scmp.lt.s32.totalorder %s1516_s17, 1  ;;  %v1421_v0 = vmov 1   ;;  %v1422_v1 = vmov 4   ;;  %s2082_s0 = sld [smem:[#allocation12_spill]]  ;;  %v413_v2 = vld [vmem:[#allocation5] sm:$0xff]  ;;  %v1423_v4 = vmov 0   ;;  %v428_v25 = vlaneseq }
  0x44   : > { %1397 = vsyncadd (%p2081_p0), [#allocation6], 4294967040  ;;  %1251 = vset.pattern.permute.xlu1 %v1421_v0  ;;  %1249 = vset.pattern.permute.xlu0 %v1422_v1  ;;  %s1424_s26 = smov 17   ;;  %v1425_v6 = vmov 2   ;;  %s1426_s28 = smov 16   ;;  %v1427_v7 = vmov 3  }
  0x45   : > { %s392_s25 = scalar_select %p391_p1, %s1516_s17, 1  ;;  %490 = vperm.xlu1 %1251, %v413_v2   ;;  %419 = vperm.xlu0 %1249, %v413_v2   ;;  %v1428_v8 = vmov 5   ;;  %v1430_v9 = vmov 6   ;;  %v1432_v10 = vmov 7   ;;  %v1433_v11 = vmov 8   ;;  %v414_v12 = vld [vmem:[%s2048_s3] sm:$0xff] }
  0x46   : > { %s1429_s11 = smov 15   ;;  %s1431_s27 = smov 1   ;;  %v1640_v13 = vld [vmem:[#allocation7] sm:$0xff]  ;;  %v1438_v14 = vmov 0.0   ;;  %v416_v15 = vld [vmem:[%s2050_s5] sm:$0xff]  ;;  %v435_v29 = vshrl.u32 %v428_v25, 7 }
  0x47   : > { %s1159_s29 = sshll.u32 %s392_s25, 4  ;;  %s1434_s18 = smov 127   ;;  %792 = vmatprep.mubr.f32.mxu0 %v1438_v14  ;;  %1021 = vmatprep.mubr.f32.mxu1 %v1438_v14  ;;  %v1666_v18 = vld [vmem:[#allocation2] sm:$0xf]  ;;  %v1719_v43 = vand.u32 127, %v428_v25 }
  0x48   : > { %s1435_s20 = smov 111   ;;  %s1436_s30 = smov 113   ;;  %vm397_vm0 = vcmp.ge.s32.totalorder %v1666_v18, 1  ;;  %vm403_vm1 = vcmp.lt.s32.totalorder %v1666_v18, 15  ;;  %v1701_v33 = vsub.s32 0, %v435_v29  ;;  %v1703_v34 = vsub.s32 2, %v435_v29 }
  0x49   : > { %s395_s21 = scalar_lea.vmem %s2082_s0, %s1159_s29  ;;  %1250 = vset.pattern.permute.xlu0 %v1423_v4  ;;  %1259 = vset.pattern.permute.xlu1 %v1423_v4  ;;  %s1437_s12 = smov 112   ;;  %v398_v20 = vsel %vm397_vm0, 1, %v1423_v4  ;;  %v1678_v23 = vsel %vm403_vm1, 1, %v1423_v4  ;;  %v542_v42 = vsub.s32 1, %v435_v29  ;;  %v546_v45 = vsub.s32 3, %v435_v29 }
  0x4a   : > { %v1606_v3 = vld [vmem:[%s395_s21] sm:$0xff]  ;;  %455 = vperm.xlu0 %1250, %v413_v2   ;;  %v1611_v5 = vld [vmem:[%s395_s21 + $0x8] sm:$0xff]  ;;  %v1150_v22 = vrot.slane %v398_v20, 9  ;;  %v1151_v27 = vrot.slane %v1678_v23, 9  ;;  %v472_v44 = vrot.slane %v398_v20, %v1701_v33  ;;  %v476_v47 = vrot.slane %v398_v20, %v1703_v34  ;;  %p2108_p2 = scmp.ne.s32.totalorder %s2073_s23, 0 }
  0x4b   : > { %424 = vrot.lane.b32.xlu1 %v1606_v3, %s1424_s26  ;;  %v543_v53 = vrot.slane %v398_v20, %v542_v42  ;;  %vm430_vm7 = vcmp.lt.s32.totalorder %v1719_v43, 17  ;;  %v547_v55 = vrot.slane %v398_v20, %v546_v45  ;;  %v578_v56 = vrot.slane %v1678_v23, %v542_v42 }
  0x4c   : > { %vm1685_vm2 = vcmp.ne.s32.totalorder %v1150_v22, 0  ;;  %vm1697_vm4 = vcmp.ne.s32.totalorder %v1151_v27, 0  ;;  %v1739_v54 = vrot.slane %v472_v44, %v1701_v33  ;;  %v582_v57 = vrot.slane %v1678_v23, %v546_v45 }
  0x4d   : > { %vm402_vm3 = vmand %vm397_vm0, %vm1685_vm2  ;;  %v1745_v59 = vrot.slane %v476_v47, %v1701_v33  ;;  %vm2060_vm10 = vcmp.lt.s32.totalorder %v1719_v43, 16  ;;  %v1756_v62 = vrot.slane %v543_v53, %v542_v42  ;;  %vm501_vm13 = vcmp.lt.s32.totalorder %v1719_v43, 15 }
  0x4e   : > { %1252 = vset.pattern.permute.xlu0 %v1425_v6  ;;  %v433_v36 = vsel %vm402_vm3, 1, %v1423_v4  ;;  %vm408_vm5 = vmand %vm397_vm0, %vm1697_vm4  ;;  %vm2061_vm11 = vcmp.eq.s32.totalorder %v1739_v54, 1  ;;  %vm537_vm0 = vcmp.lt.s32.totalorder %v1719_v43, 1 }
  0x4f   : > { %426 = vrot.lane.b32.xlu1 %v1611_v5, %s1424_s26  ;;  %526 = vperm.xlu0 %1252, %v413_v2   ;;  %v437_v38 = vrot.slane %v433_v36, %v1701_v33  ;;  %v441_v39 = vrot.slane %v433_v36, %v1703_v34  ;;  %v504_v40 = vsel %vm408_vm5, 1, %v1423_v4  ;;  %vm409_vm6 = vmand %vm403_vm1, %vm1685_vm2  ;;  %vm486_vm12 = vcmp.eq.s32.totalorder %v1745_v59, 1 }
  0x50   : > { %v508_v48 = vrot.slane %v504_v40, %v1701_v33  ;;  %v512_v49 = vrot.slane %v504_v40, %v1703_v34  ;;  %v610_v58 = vsel %vm409_vm6, 1, %v1423_v4  ;;  %vm556_vm2 = vcmp.eq.s32.totalorder %v1756_v62, 1 }
  0x51   : > { %v1732_v50 = vrot.slane %v437_v38, %v1701_v33  ;;  %v1735_v51 = vrot.slane %v441_v39, %v1701_v33  ;;  %vm2064_vm5 = vcmp.lt.s32.totalorder %v1719_v43, 127 }
  0x52   : > { %v1748_v60 = vrot.slane %v508_v48, %v1701_v33  ;;  %v1751_v61 = vrot.slane %v512_v49, %v1701_v33 }
  0x53   : > { %462 = vrot.lane.b32.xlu1 %v1606_v3, %s1426_s28  ;;  %1253 = vset.pattern.permute.xlu0 %v1427_v7  ;;  %vm450_vm8 = vcmp.eq.s32.totalorder %v1732_v50, 1  ;;  %vm2059_vm9 = vcmp.eq.s32.totalorder %v1735_v51, 1 }
  0x54   : > { %561 = vperm.xlu0 %1253, %v413_v2   ;;  %vm521_vm14 = vcmp.eq.s32.totalorder %v1748_v60, 1  ;;  %vm522_vm15 = vcmp.eq.s32.totalorder %v1751_v61, 1 }
  0x57   : > { %464 = vrot.lane.b32.xlu1 %v1611_v5, %s1426_s28 }
  0x58   : > { %1254 = vset.pattern.permute.xlu0 %v1428_v8 }
  0x59   : > { %596 = vperm.xlu0 %1254, %v413_v2  }
  0x5b   : > { %497 = vrot.lane.b32.xlu1 %v1606_v3, %s1429_s11 }
  0x5d   : > { %1255 = vset.pattern.permute.xlu0 %v1430_v9 }
  0x5e   : > { %632 = vperm.xlu0 %1255, %v413_v2  }
  0x5f   : > { %499 = vrot.lane.b32.xlu1 %v1611_v5, %s1429_s11 }
  0x62   : > { %1256 = vset.pattern.permute.xlu0 %v1432_v10 }
  0x63   : > { %533 = vrot.lane.b32.xlu1 %v1606_v3, %s1431_s27  ;;  %667 = vperm.xlu0 %1256, %v413_v2  }
  0x67   : > { %535 = vrot.lane.b32.xlu1 %v1611_v5, %s1431_s27  ;;  %1257 = vset.pattern.permute.xlu0 %v1433_v11 }
  0x68   : > { %703 = vperm.xlu0 %1257, %v413_v2  }
  0x6b   : > { %568 = vrot.lane.b32.xlu1 %v1606_v3, %s1434_s18 }
  0x6c   : > { %674 = vrot.lane.b32.xlu0 %v1606_v3, %s1435_s20 }
  0x6d   : > { %1258 = vset.pattern.permute.xlu0 %v1423_v4 }
  0x6f   : > { %570 = vrot.lane.b32.xlu1 %v1611_v5, %s1434_s18 }
  0x70   : > { %712 = vperm.xlu0 %1258, %v414_v12  }
  0x73   : > { %603 = vrot.lane.b32.xlu1 %v1606_v3, %s1436_s30 }
  0x74   : > { %821 = vperm.xlu0 %1258, %v1640_v13  }
  0x77   : > { %605 = vrot.lane.b32.xlu1 %v1611_v5, %s1436_s30 }
  0x78   : > { %1262 = vset.pattern.permute.xlu0 %v1425_v6  ;;  %v614_v6 = vrot.slane %v610_v58, %v1701_v33 }
  0x79   : > { %853 = vperm.xlu0 %1262, %v1640_v13  }
  0x7b   : > { %639 = vrot.lane.b32.xlu1 %v1606_v3, %s1437_s12 }
  0x7d   : > { %1263 = vset.pattern.permute.xlu0 %v1427_v7  ;;  %v618_v7 = vrot.slane %v610_v58, %v1703_v34 }
  0x7e   : > { %869 = vperm.xlu0 %1263, %v1640_v13  }
  0x7f   : > { %641 = vrot.lane.b32.xlu1 %v1611_v5, %s1437_s12  ;;  %v1791_v20 = vrot.slane %v618_v7, %v1701_v33 }
  0x82   : > { %1264 = vset.pattern.permute.xlu0 %v1428_v8  ;;  %v555_v8 = vrot.slane %v547_v55, %v542_v42 }
  0x83   : > { %676 = vrot.lane.b32.xlu1 %v1611_v5, %s1435_s20  ;;  %885 = vperm.xlu0 %1264, %v1640_v13  }
  0x84   : > { %vm1793_vm3 = vcmp.eq.s32.totalorder %v555_v8, 1 }
  0x87   : > { %1265 = vset.pattern.permute.xlu0 %v1430_v9  ;;  %721 = vperm.xlu1 %1259, %v416_v15   ;;  %v1767_v9 = vrot.slane %v578_v56, %v542_v42 }
  0x88   : > { %901 = vperm.xlu0 %1265, %v1640_v13  }
  0x89   : > { %vm2063_vm6 = vcmp.eq.s32.totalorder %v1767_v9, 1 }
  0x8b   : > { %1260 = vset.pattern.permute.xlu1 %v1422_v1 }
  0x8c   : > { %1266 = vset.pattern.permute.xlu0 %v1432_v10  ;;  %807 = vperm.xlu1 %1260, %v1640_v13   ;;  %v590_v10 = vrot.slane %v582_v57, %v542_v42 }
  0x8d   : > { %917 = vperm.xlu0 %1266, %v1640_v13  }
  0x90   : > { %1261 = vset.pattern.permute.xlu1 %v1421_v0 }
  0x91   : > { %1267 = vset.pattern.permute.xlu0 %v1433_v11  ;;  %837 = vperm.xlu1 %1261, %v1640_v13  }
  0x95   : > { %1269 = vset.pattern.permute.xlu1 %v1423_v4 }
  0xc0   : > { %v1664_v16 = vpop.permute.xlu1 %490  ;;  %v1680_v24 = vpop.permute.xlu0 %419 }
  0xc4   : > { %v425_v17 = vpop.permute.xlu1 %424 }
  0xc5   : > { %v1691_v31 = vpop.permute.xlu0 %455 }
  0xc8   : > { %v427_v19 = vpop.permute.xlu1 %426 }
  0xc9   : > { %v431_v1 = vsel %vm430_vm7, %v425_v17, %v427_v19  ;;  %v432_v2 = vsel %vm430_vm7, %v427_v19, %v425_v17  ;;  %v1788_v19 = vrot.slane %v614_v6, %v1701_v33 }
  0xca   : > { %v1712_v37 = vpop.permute.xlu0 %526  ;;  %v452_v11 = vsel %vm450_vm8, %v432_v2, 0.0  ;;  %v453_v12 = vsel %vm2059_vm9, %v431_v1, 0.0  ;;  %vm1799_vm9 = vcmp.eq.s32.totalorder %v590_v10, 1 }
  0xcb   : > { %v458_v28 = vmul.f32 %v1691_v31, %v452_v11  ;;  %v459_v29 = vmul.f32 %v1691_v31, %v453_v12 }
  0xcc   : > { %v1673_v21 = vpop.permute.xlu1 %462 }
  0xcf   : > { %v1722_v46 = vpop.permute.xlu0 %561 }
  0xd0   : > { %v1682_v26 = vpop.permute.xlu1 %464 }
  0xd1   : > { %v467_v15 = vsel %vm2060_vm10, %v1673_v21, %v1682_v26  ;;  %v468_v17 = vsel %vm2060_vm10, %v1682_v26, %v1673_v21  ;;  %vm410_vm10 = vmand %vm403_vm1, %vm1697_vm4  ;;  %v422_v21 = vmul.f32 %v1680_v24, %v1606_v3  ;;  %v423_v26 = vmul.f32 %v1680_v24, %v1611_v5 }
  0xd2   : > { %v487_v36 = vsel %vm2061_vm11, %v468_v17, 0.0  ;;  %v488_v38 = vsel %vm486_vm12, %v467_v15, 0.0  ;;  %vm2062_vm1 = vcmp.lt.s32.totalorder %v1719_v43, 113  ;;  %vm2066_vm4 = vcmp.eq.s32.totalorder %v1788_v19, 1 }
  0xd3   : > { %vm2065_vm11 = vcmp.eq.s32.totalorder %v1791_v20, 1  ;;  %v681_v24 = vsel %vm410_vm10, 1, %v1423_v4  ;;  %v493_v39 = vmul.f32 %v1664_v16, %v487_v36  ;;  %v494_v40 = vmul.f32 %v1664_v16, %v488_v38 }
  0xd4   : > { %v1689_v30 = vpop.permute.xlu1 %497  ;;  %v1758_v0 = vpop.permute.xlu0 %596  ;;  %v460_v45 = vadd.f32 %v458_v28, %v422_v21  ;;  %v461_v47 = vadd.f32 %v459_v29, %v423_v26  ;;  %v685_v49 = vrot.slane %v681_v24, %v1701_v33  ;;  %vm643_vm10 = vcmp.lt.s32.totalorder %v1719_v43, 112 }
  0xd6   : > { %v495_v1 = vadd.f32 %v493_v39, %v460_v45  ;;  %v496_v2 = vadd.f32 %v494_v40, %v461_v47  ;;  %v1877_v12 = vrot.slane %v685_v49, %v1701_v33 }
  0xd8   : > { %v1705_v35 = vpop.permute.xlu1 %499 }
  0xd9   : > { %v1803_v27 = vpop.permute.xlu0 %632  ;;  %v502_v18 = vsel %vm501_vm13, %v1689_v30, %v1705_v35  ;;  %v503_v3 = vsel %vm501_vm13, %v1705_v35, %v1689_v30  ;;  %v649_v30 = vrot.slane %v1678_v23, %v1701_v33  ;;  %v653_v35 = vrot.slane %v1678_v23, %v1703_v34 }
  0xda   : > { %v523_v42 = vsel %vm521_vm14, %v503_v3, 0.0  ;;  %v524_v44 = vsel %vm522_vm15, %v502_v18, 0.0 }
  0xdb   : > { %v529_v56 = vmul.f32 %v1712_v37, %v523_v42  ;;  %v530_v57 = vmul.f32 %v1712_v37, %v524_v44  ;;  %v1860_v58 = vrot.slane %v649_v30, %v1701_v33 }
  0xdc   : > { %v1717_v41 = vpop.permute.xlu1 %533 }
  0xdd   : > { %v531_v15 = vadd.f32 %v529_v56, %v495_v1  ;;  %v532_v17 = vadd.f32 %v530_v57, %v496_v2 }
  0xde   : > { %v668_v48 = vpop.permute.xlu0 %667 }
  0xe0   : > { %v536_v52 = vpop.permute.xlu1 %535 }
  0xe1   : > { %v538_v31 = vsel %vm537_vm0, %v1717_v41, %v536_v52  ;;  %v539_v32 = vsel %vm537_vm0, %v536_v52, %v1717_v41  ;;  %v689_v52 = vrot.slane %v681_v24, %v1703_v34  ;;  %v1863_v34 = vrot.slane %v653_v35, %v1701_v33 }
  0xe2   : > { %v558_v23 = vsel %vm556_vm2, %v539_v32, 0.0  ;;  %v559_v16 = vsel %vm1793_vm3, %v538_v31, 0.0 }
  0xe3   : > { %v565_v8 = vmul.f32 %v1722_v46, %v559_v16  ;;  %v704_v26 = vpop.permute.xlu0 %703 }
  0xe4   : > { %v569_v63 = vpop.permute.xlu1 %568 }
  0xe7   : > { %v675_v39 = vpop.permute.xlu0 %674 }
  0xe8   : > { %v571_v14 = vpop.permute.xlu1 %570 }
  0xe9   : > { %v573_v53 = vsel %vm2064_vm5, %v569_v63, %v571_v14  ;;  %v574_v55 = vsel %vm2064_vm5, %v571_v14, %v569_v63  ;;  %v564_v63 = vmul.f32 %v1722_v46, %v558_v23  ;;  %v1880_v14 = vrot.slane %v689_v52, %v1701_v33 }
  0xea   : > { %v593_v37 = vsel %vm2063_vm6, %v573_v53, 0.0  ;;  %v594_v10 = vsel %vm1799_vm9, %v574_v55, 0.0  ;;  %vm2071_vm6 = vcmp.eq.s32.totalorder %v1863_v34, 1  ;;  %v567_v33 = vadd.f32 %v565_v8, %v532_v17 }
  0xeb   : > { %v599_v28 = vmul.f32 %v1758_v0, %v593_v37  ;;  %v600_v29 = vmul.f32 %v1758_v0, %v594_v10  ;;  %v566_v36 = vadd.f32 %v564_v63, %v531_v15  ;;  %vm2067_vm5 = vcmp.lt.s32.totalorder %v1719_v43, 111  ;;  %v713_v56 = vpop.permute.xlu0 %712 }
  0xec   : > { %v604_v5 = vpop.permute.xlu1 %603 }
  0xed   : > { %v601_v32 = vadd.f32 %v599_v28, %v566_v36  ;;  %v602_v30 = vadd.f32 %v600_v29, %v567_v33 }
  0xf0   : > { %v606_v41 = vpop.permute.xlu1 %605 }
  0xf1   : > { %v608_v6 = vsel %vm2062_vm1, %v604_v5, %v606_v41  ;;  %v609_v7 = vsel %vm2062_vm1, %v606_v41, %v604_v5  ;;  %vm662_vm1 = vcmp.eq.s32.totalorder %v1860_v58, 1 }
  0xf2   : > { %v629_v46 = vsel %vm2066_vm4, %v608_v6, 0.0  ;;  %v630_v21 = vsel %vm2065_vm11, %v609_v7, 0.0  ;;  %vm2070_vm11 = vcmp.eq.s32.totalorder %v1877_v12, 1  ;;  %vm2069_vm4 = vcmp.eq.s32.totalorder %v1880_v14, 1  ;;  %v415_v7 = vld [vmem:[%s2049_s4] sm:$0xff] }
  0xf3   : > { %v635_v18 = vmul.f32 %v1803_v27, %v629_v46  ;;  %v636_v3 = vmul.f32 %v1803_v27, %v630_v21  ;;  %v822_v21 = vpop.permute.xlu0 %821 }
  0xf4   : > { %v640_v11 = vpop.permute.xlu1 %639 }
  0xf5   : > { %v637_v42 = vadd.f32 %v635_v18, %v601_v32  ;;  %v638_v44 = vadd.f32 %v636_v3, %v602_v30 }
  0xf7   : > { %v854_v28 = vpop.permute.xlu0 %853 }
  0xf8   : > { %v642_v38 = vpop.permute.xlu1 %641 }
  0xf9   : > { %v644_v5 = vsel %vm643_vm10, %v640_v11, %v642_v38  ;;  %v645_v24 = vsel %vm643_vm10, %v642_v38, %v640_v11  ;;  %v802_v11 = vld [vmem:[%s2052_s7] sm:$0xff] }
  0xfa   : > { %v664_v0 = vsel %vm662_vm1, %v644_v5, 0.0  ;;  %v665_v31 = vsel %vm2071_vm6, %v645_v24, 0.0  ;;  %vm2094_vm6 = vcmp.eq.s32.totalorder %v1739_v54, 1 }
  0xfb   : > { %v670_v35 = vmul.f32 %v668_v48, %v664_v0  ;;  %v671_v27 = vmul.f32 %v668_v48, %v665_v31  ;;  %v870_v36 = vpop.permute.xlu0 %869 }
  0xfc   : > { %v677_v40 = vpop.permute.xlu1 %676 }
  0xfd   : > { %v679_v45 = vsel %vm2067_vm5, %v675_v39, %v677_v40  ;;  %v680_v47 = vsel %vm2067_vm5, %v677_v40, %v675_v39  ;;  %v672_v16 = vadd.f32 %v670_v35, %v637_v42  ;;  %v673_v48 = vadd.f32 %v671_v27, %v638_v44 }
  0xfe   : > { %v700_v41 = vsel %vm2070_vm11, %v679_v45, 0.0  ;;  %v701_v49 = vsel %vm2069_vm4, %v680_v47, 0.0  ;;  %vm2068_vm5 = vcmask 64512   ;;  %vm2092_vm4 = vcmp.lt.s32.totalorder %v1719_v43, 16 }
  0xff   : > { %v706_v52 = vmul.f32 %v704_v26, %v700_v41  ;;  %v707_v23 = vmul.f32 %v704_v26, %v701_v49  ;;  %v886_v18 = vpop.permute.xlu0 %885  ;;  %vm2093_vm11 = vmmov %vm2092_vm4 }
 0x101   : > { %v708_v53 = vadd.f32 %v706_v52, %v672_v16  ;;  %v709_v55 = vadd.f32 %v707_v23, %v673_v48 }
 0x102   : > { %v722_v63 = vpop.permute.xlu1 %721 }
 0x103   : > { %v715_v57 = vadd.f32 %v713_v56, %v708_v53  ;;  %v716_v1 = vadd.f32 %v713_v56, %v709_v55  ;;  %v902_v5 = vpop.permute.xlu0 %901 }
 0x105   : > { %v718_v2 = vmax.f32 %v716_v1, 0.0  ;;  %v717_v6 = vmax.f32 %v715_v57, 0.0 }
 0x107   : > { %758 = vmatprep.subr.mxu0 %v718_v2  ;;  %v808_v46 = vpop.permute.xlu1 %807 }
 0x108   : > { %759 = vmatpush1.msra.mxu0 %v717_v6  ;;  %v1939_v31 = vpop.permute.xlu0 %917 }
 0x109   : > { %1152 = vmatmul.mubr.msk.f32.vlgmr.msra.gmra.mxu0 %vm2068_vm5, %v415_v7  ;;  %vm2091_vm5 = vcmp.eq.s32.totalorder %v1735_v51, 1 }
 0x10c   : > { %v838_v26 = vpop.permute.xlu1 %837 }
 0x1c9   : > { %v794_v8 = vpop.f32.mrf.mxu0 }
 0x1ca   : > { %v795_v37 = vadd.f32 %v794_v8, %v722_v63 }
 0x1cb   : > { %v796_v15 = vpop.f32.mrf.mxu0 }
 0x1cc   : > { %v799_v10 = vmax.f32 %v795_v37, 0.0  ;;  %v797_v17 = vadd.f32 %v796_v15, %v722_v63 }
 0x1ce   : > { %828 = vrot.lane.b32.xlu1 %v799_v10, %s1426_s28  ;;  %812 = vrot.lane.b32.xlu0 %v799_v10, %s1424_s26  ;;  %v810_v48 = vmul.f32 %v808_v46, %v799_v10 }
 0x1d2   : > { %844 = vrot.lane.b32.xlu1 %v799_v10, %s1429_s11  ;;  %933 = vperm.xlu0 %1267, %v1640_v13   ;;  %v800_v13 = vmax.f32 %v797_v17, 0.0 }
 0x1d4   : > { %v811_v53 = vmul.f32 %v808_v46, %v800_v13 }
 0x1d6   : > { %860 = vrot.lane.b32.xlu1 %v799_v10, %s1431_s27  ;;  %924 = vrot.lane.b32.xlu0 %v799_v10, %s1435_s20 }
 0x1d7   : > { %1268 = vset.pattern.permute.xlu0 %v1423_v4  ;;  %v804_v4 = vld [vmem:[%s2054_s9] sm:$0xff] }
 0x1da   : > { %876 = vrot.lane.b32.xlu1 %v799_v10, %s1434_s18  ;;  %942 = vperm.xlu0 %1268, %v802_v11  }
 0x1de   : > { %892 = vrot.lane.b32.xlu1 %v799_v10, %s1436_s30 }
 0x1e2   : > { %908 = vrot.lane.b32.xlu1 %v799_v10, %s1437_s12 }
 0x1e6   : > { %814 = vrot.lane.b32.xlu1 %v800_v13, %s1424_s26 }
 0x1ea   : > { %830 = vrot.lane.b32.xlu1 %v800_v13, %s1426_s28  ;;  %s1439_s28 = smov [#allocation8]  }
 0x1ee   : > { %846 = vrot.lane.b32.xlu1 %v800_v13, %s1429_s11  ;;  %s388_s11 = sand.u32 1, %s1408_s14  }
 0x1ef   : > { %s1033_s25 = scalar_lea.sflag [#allocation4], %s388_s11 }
 0x1f2   : > { %862 = vrot.lane.b32.xlu1 %v800_v13, %s1431_s27  ;;  %s1147_s27 = sshll.u32 %s388_s11, 4 }
 0x1f6   : > { %878 = vrot.lane.b32.xlu1 %v800_v13, %s1434_s18  ;;  %s1160_s18 = sshll.u32 %s1516_s17, 8  ;;  %s1352_s17 = sshll.u32 %s1439_s28, 4  ;;  %s1353_s17 = int_to_ptr.vmem [resolvable:$false] %s1352_s17 }
 0x1f7   : > { %s1045_s21 = scalar_lea.hbm %s2055_s10, %s1160_s18 }
 0x1fa   : > { %894 = vrot.lane.b32.xlu1 %v800_v13, %s1436_s30 }
 0x1fe   : > { %910 = vrot.lane.b32.xlu1 %v800_v13, %s1437_s12 }
 0x202   : > { %926 = vrot.lane.b32.xlu1 %v800_v13, %s1435_s20  ;;  %s390_s20 = scalar_lea.vmem [#allocation8], %s1147_s27  ;;  %s1354_s27 = scalar_lea.vmem %s1353_s17, 512 }
 0x203   : > { %s1047_s30 = sshll.u32 %s390_s20, 4  ;;  %s1048_s30 = int_to_ptr.vmem [resolvable:$true] %s1047_s30 }
 0x204   : > { %s1348_s26 = scalar_lea.vmem %s1048_s30, 256  ;;  %p1355_p4 = scmp.lt.s32.totalorder %s1048_s30, %s1353_s17 }
 0x205   : > { %p1349_p12 = scmp.ne.s32.totalorder %s1048_s30, %s1348_s26  ;;  %p1356_p5 = scmp.lt.s32.totalorder %s1354_s27, %s1348_s26 }
 0x206   : > { %951 = vperm.xlu1 %1269, %v804_v4  }
 0x207   : > { %p1350_p9 = pnand %p1349_p12, %p2108_p2  ;;  %p1357_p6 = por %p1356_p5, %p1355_p4 }
 0x209   : > { %p1351_p3 = pneg %p1350_p9 }
 0x20b   : > { %p1358_p10 = pnand %p1357_p6, %p1351_p3 }
 0x240   : > { %v829_v29 = vpop.permute.xlu1 %828  ;;  %v813_v30 = vpop.permute.xlu0 %812 }
 0x244   : > { %v845_v33 = vpop.permute.xlu1 %844 }
 0x248   : > { %v861_v38 = vpop.permute.xlu1 %860 }
 0x24c   : > { %v877_v3 = vpop.permute.xlu1 %876 }
 0x250   : > { %v893_v24 = vpop.permute.xlu1 %892 }
 0x254   : > { %v909_v0 = vpop.permute.xlu1 %908 }
 0x258   : > { %v815_v32 = vpop.permute.xlu1 %814 }
 0x259   : > { %v816_v27 = vsel %vm430_vm7, %v813_v30, %v815_v32  ;;  %v817_v39 = vsel %vm430_vm7, %v815_v32, %v813_v30  ;;  %vm2095_vm7 = vcmp.lt.s32.totalorder %v1719_v43, 127 }
 0x25a   : > { %v818_v40 = vsel %vm450_vm8, %v817_v39, 0.0  ;;  %v819_v42 = vsel %vm2091_vm5, %v816_v27, 0.0  ;;  %vm2096_vm8 = vmmov %vm2095_vm7  ;;  %vm2106_vm5 = vcmp.eq.s32.totalorder %v1880_v14, 1 }
 0x25b   : > { %v824_v41 = vmul.f32 %v822_v21, %v818_v40  ;;  %v825_v49 = vmul.f32 %v822_v21, %v819_v42 }
 0x25c   : > { %v831_v35 = vpop.permute.xlu1 %830 }
 0x25d   : > { %v832_v45 = vsel %vm2092_vm4, %v829_v29, %v831_v35  ;;  %v833_v47 = vsel %vm2093_vm11, %v831_v35, %v829_v29  ;;  %v826_v2 = vadd.f32 %v824_v41, %v810_v48  ;;  %v827_v6 = vadd.f32 %v825_v49, %v811_v53 }
 0x25e   : > { %v834_v52 = vsel %vm2094_vm6, %v833_v47, 0.0  ;;  %v835_v23 = vsel %vm486_vm12, %v832_v45, 0.0  ;;  %vm2097_vm11 = vcmp.eq.s32.totalorder %v1767_v9, 1  ;;  %vm2098_vm12 = vcmp.lt.s32.totalorder %v1719_v43, 113 }
 0x25f   : > { %v840_v54 = vmul.f32 %v838_v26, %v834_v52  ;;  %v841_v57 = vmul.f32 %v838_v26, %v835_v23  ;;  %v934_v26 = vpop.permute.xlu0 %933  ;;  %vm2107_vm6 = vcmask 64512  }
 0x260   : > { %v847_v44 = vpop.permute.xlu1 %846 }
 0x261   : > { %v848_v50 = vsel %vm501_vm13, %v845_v33, %v847_v44  ;;  %v849_v51 = vsel %vm501_vm13, %v847_v44, %v845_v33  ;;  %v842_v15 = vadd.f32 %v840_v54, %v826_v2  ;;  %v843_v61 = vadd.f32 %v841_v57, %v827_v6  ;;  %vm2099_vm13 = vmmov %vm2098_vm12 }
 0x262   : > { %v850_v59 = vsel %vm521_vm14, %v849_v51, 0.0  ;;  %v851_v1 = vsel %vm522_vm15, %v848_v50, 0.0  ;;  %vm2100_vm14 = vcmp.eq.s32.totalorder %v1788_v19, 1  ;;  %vm2101_vm15 = vcmp.eq.s32.totalorder %v1791_v20, 1 }
 0x263   : > { %v856_v60 = vmul.f32 %v854_v28, %v850_v59  ;;  %v857_v11 = vmul.f32 %v854_v28, %v851_v1  ;;  %v925_v44 = vpop.permute.xlu0 %924 }
 0x264   : > { %v863_v16 = vpop.permute.xlu1 %862 }
 0x265   : > { %v864_v55 = vsel %vm537_vm0, %v861_v38, %v863_v16  ;;  %v865_v56 = vsel %vm537_vm0, %v863_v16, %v861_v38  ;;  %v858_v29 = vadd.f32 %v856_v60, %v842_v15  ;;  %v859_v28 = vadd.f32 %v857_v11, %v843_v61 }
 0x266   : > { %v866_v63 = vsel %vm556_vm2, %v865_v56, 0.0  ;;  %v867_v8 = vsel %vm1793_vm3, %v864_v55, 0.0  ;;  %vm2103_vm0 = vcmp.lt.s32.totalorder %v1719_v43, 111  ;;  %vm2105_vm3 = vcmp.eq.s32.totalorder %v1877_v12, 1  ;;  %v803_v12 = vld [vmem:[%s2053_s8] sm:$0xff] }
 0x267   : > { %v872_v17 = vmul.f32 %v870_v36, %v866_v63  ;;  %v873_v13 = vmul.f32 %v870_v36, %v867_v8  ;;  %vm2104_vm2 = vmmov %vm2103_vm0  ;;  %v943_v50 = vpop.permute.xlu0 %942 }
 0x268   : > { %v879_v7 = vpop.permute.xlu1 %878 }
 0x269   : > { %v880_v37 = vsel %vm2095_vm7, %v877_v3, %v879_v7  ;;  %v881_v10 = vsel %vm2096_vm8, %v879_v7, %v877_v3  ;;  %v874_v25 = vadd.f32 %v872_v17, %v858_v29  ;;  %v875_v3 = vadd.f32 %v873_v13, %v859_v28 }
 0x26a   : > { %v882_v4 = vsel %vm2097_vm11, %v880_v37, 0.0  ;;  %v883_v62 = vsel %vm1799_vm9, %v881_v10, 0.0  ;;  %vm2102_vm9 = vcmp.eq.s32.totalorder %v1863_v34, 1 }
 0x26b   : > { %v888_v36 = vmul.f32 %v886_v18, %v882_v4  ;;  %v889_v38 = vmul.f32 %v886_v18, %v883_v62 }
 0x26c   : > { %v895_v22 = vpop.permute.xlu1 %894 }
 0x26d   : > { %v896_v46 = vsel %vm2098_vm12, %v893_v24, %v895_v22  ;;  %v897_v21 = vsel %vm2099_vm13, %v895_v22, %v893_v24  ;;  %v890_v39 = vadd.f32 %v888_v36, %v874_v25  ;;  %v891_v40 = vadd.f32 %v889_v38, %v875_v3 }
 0x26e   : > { %v898_v33 = vsel %vm2100_vm14, %v896_v46, 0.0  ;;  %v899_v9 = vsel %vm2101_vm15, %v897_v21, 0.0 }
 0x26f   : > { %v904_v30 = vmul.f32 %v902_v5, %v898_v33  ;;  %v905_v35 = vmul.f32 %v902_v5, %v899_v9 }
 0x270   : > { %v911_v32 = vpop.permute.xlu1 %910 }
 0x271   : > { %v912_v27 = vsel %vm643_vm10, %v909_v0, %v911_v32  ;;  %v913_v24 = vsel %vm643_vm10, %v911_v32, %v909_v0  ;;  %v906_v45 = vadd.f32 %v904_v30, %v890_v39  ;;  %v907_v47 = vadd.f32 %v905_v35, %v891_v40 }
 0x272   : > { %v914_v19 = vsel %vm662_vm1, %v912_v27, 0.0  ;;  %v915_v20 = vsel %vm2102_vm9, %v913_v24, 0.0 }
 0x273   : > { %v920_v18 = vmul.f32 %v1939_v31, %v914_v19  ;;  %v921_v42 = vmul.f32 %v1939_v31, %v915_v20 }
 0x274   : > { %v927_v5 = vpop.permute.xlu1 %926 }
 0x275   : > { %v928_v41 = vsel %vm2103_vm0, %v925_v44, %v927_v5  ;;  %v929_v58 = vsel %vm2104_vm2, %v927_v5, %v925_v44  ;;  %v922_v31 = vadd.f32 %v920_v18, %v906_v45  ;;  %v923_v23 = vadd.f32 %v921_v42, %v907_v47 }
 0x276   : > { %v930_v34 = vsel %vm2105_vm3, %v928_v41, 0.0  ;;  %v931_v0 = vsel %vm2106_vm5, %v929_v58, 0.0 }
 0x277   : > { %v936_v49 = vmul.f32 %v934_v26, %v930_v34  ;;  %v937_v52 = vmul.f32 %v934_v26, %v931_v0 }
 0x279   : > { %v938_v51 = vadd.f32 %v936_v49, %v922_v31  ;;  %v939_v16 = vadd.f32 %v937_v52, %v923_v23 }
 0x27b   : > { %v945_v48 = vadd.f32 %v943_v50, %v938_v51  ;;  %v946_v53 = vadd.f32 %v943_v50, %v939_v16 }
 0x27d   : > { %v947_v55 = vmax.f32 %v945_v48, 0.0  ;;  %v948_v43 = vmax.f32 %v946_v53, 0.0 }
 0x27f   : > { %987 = vmatprep.subr.mxu1 %v948_v43 }
 0x280   : > { %988 = vmatpush1.msra.mxu1 %v947_v55 }
 0x281   : > { %1153 = vmatmul.mubr.msk.f32.vlgmr.msra.gmra.mxu1 %vm2107_vm6, %v803_v12  ;;  %v952_v14 = vpop.permute.xlu1 %951 }
 0x341   : > { %v1023_v56 = vpop.f32.mrf.mxu1 }
 0x342   : > { %v1024_v54 = vadd.f32 %v1023_v56, %v952_v14 }
 0x343   : > { %v1025_v57 = vpop.f32.mrf.mxu1 }
 0x344   : > { %v1028_v59 = vmax.f32 %v1024_v54, 0.0  ;;  %v1026_v1 = vadd.f32 %v1025_v57, %v952_v14 }
 0x346   : > { %1030 = vst [vmem:[%s390_s20] sm:$0xff] %v1028_v59  ;;  %v1029_v2 = vmax.f32 %v1026_v1, 0.0 }
 0x348   : > { %1031 = vst [vmem:[%s390_s20 + $0x8] sm:$0xff] %v1029_v2 }
 0x349   : > { %1361 = shalt.err (!%p1358_p10)
}
 0x34a   : > { %s1362_s0 = scalar_lea.hbm %s1045_s21, 256  ;;  %s1366_s20 = scalar_lea.hbm %s2055_s10, 512 }
 0x34b   : > { %p1363_p7 = scmp.ne.s32.totalorder %s1045_s21, %s1362_s0  ;;  %p1367_p11 = scmp.lt.s32.totalorder %s1045_s21, %s2055_s10 }
 0x34c   : > { %p1368_p0 = scmp.lt.s32.totalorder %s1366_s20, %s1362_s0 }
 0x34d   : > { %p1364_p8 = pnand %p1363_p7, %p2108_p2 }
 0x34e   : > { %p1369_p1 = por %p1368_p0, %p1367_p11 }
 0x34f   : > { %p1365_p13 = pneg %p1364_p8 }
 0x351   : > { %p1370_p12 = pnand %p1369_p1, %p1365_p13 }
 0x353   : > { %1373 = shalt.err (!%p1370_p12)
}
 0x354   : > { %1173 = dma.vmem_to_hbm [thread:$0]  (%p2108_p2), %s1048_s30, 256, %s1045_s21, %s1033_s25  }
 0x355 PF: > { %p1195_p9 = scmp.ge.s32.totalorder %s1416_s16, 2  ;;  %s1059_s26 = sand.u32 1, %s1404_s13  }
 0x356   : > { %p2109_p3 = scmp.ne.s32.totalorder %s2074_s24, 0  ;;  %s1060_s28 = scalar_lea.sflag [#allocation4], %s1059_s26 }
 0x358   : > { %p1186_p4 = pnand %p1195_p9, %p2109_p3 }
 0x35a   : > { %p1187_p5 = pneg %p1186_p4 }
 0x35c   : > { %1399 = dma.done.wait (%p1187_p5), %s1060_s28, 256  }
 0x35d   : > { %1401 = vsyncadd (%p1187_p5), %s1060_s28, 4294967040  ;;  %p22_p6 = scmp.ge.s32.totalorder %s1520_s19, 4   ;;  %s2110_s13 = smov %s1408_s14 }
 0x35e   : > { %s2111_s14 = smov %s1412_s15  ;;  %s2112_s15 = smov %s1531_s22 }
 0x35f   : > { %s2113_s16 = smov %s1520_s19  ;;  %24 = sbr.rel (!%p22_p6) target bundleno = 7 (0x7), region = 108 }
 0x364   :  { %1065 = vsyncpa [#allocation3], 1 }
 0x365   :  { %1067 = vsyncpa [#allocation3 + $0x1], 1 }
 0x366   :  { %1068 = vsyncpa [#allocation6], 1 }
 0x367   :  { %1069 = vsyncpa [#allocation4], 1 }
 0x368   :  { %1071 = vsyncpa [#allocation4 + $0x1], 1 }

</bundles_post_ra>
